<compile_context>
chip_gen: v5e
topology: v5e:2x2
jax: 0.10.0
libtpu: 0.0.40
codegen_flags: <defaults>
</compile_context>

<pallas_src>
import functools

import jax
import jax.numpy as jnp
from jax.experimental import pallas as pl
from jax.experimental.pallas import tpu as pltpu


def _round_up(x, m):
    return ((x + m - 1) // m) * m


def ffn_kernel(x_ref, w1_ref, w2_ref, gamma_ref, beta_ref, o_ref, acc_ref, *,
               h_real, eps=1e-6):
    f = pl.program_id(1)

    @pl.when(f == 0)
    def _init():
        acc_ref[...] = jnp.zeros_like(acc_ref)

    # Hot path: two MXU matmuls in the native input dtype, f32 accumulation.
    # ReLU is elementwise over F, so it commutes with F-tiling.
    h = jnp.maximum(
        jnp.dot(x_ref[...], w1_ref[...], preferred_element_type=jnp.float32),
        0.0)
    acc_ref[...] += jnp.dot(h.astype(w2_ref.dtype), w2_ref[...],
                            preferred_element_type=jnp.float32)

    @pl.when(f == pl.num_programs(1) - 1)
    def _finalize():
        # residual add + LayerNorm over the (real) hidden dim, all in f32.
        y = acc_ref[...] + x_ref[...].astype(jnp.float32)
        h_pad = y.shape[-1]
        if h_real == h_pad:
            mean = jnp.mean(y, axis=-1, keepdims=True)
            cent = y - mean
            var = jnp.mean(cent * cent, axis=-1, keepdims=True)
        else:
            # Hidden dim was padded to a lane-dense multiple of 128: mask the
            # padded lanes out of the reduction, divide by the real H.
            lane = jax.lax.broadcasted_iota(jnp.int32, y.shape, dimension=1)
            mask = lane < h_real
            inv_h = 1.0 / float(h_real)
            y_m = jnp.where(mask, y, 0.0)
            mean = jnp.sum(y_m, axis=-1, keepdims=True) * inv_h
            cent = jnp.where(mask, y - mean, 0.0)
            var = jnp.sum(cent * cent, axis=-1, keepdims=True) * inv_h
        y_hat = (y - mean) * jax.lax.rsqrt(var + eps)
        out = (y_hat * gamma_ref[...].astype(jnp.float32)
               + beta_ref[...].astype(jnp.float32))
        o_ref[...] = out.astype(o_ref.dtype)


def meta_positionwise_ffn(x, w1, w2, gamma, beta, *, tm=512,
                          tile_vmem_budget=40 * 2**20):
    """x: (B, S, H); w1: (H, F); w2: (F, H); gamma/beta: (H,)."""
    B, S, H = x.shape
    Hw, F = w1.shape
    assert Hw == H and w2.shape == (F, H)
    N = B * S
    dtype = x.dtype
    itemsize = jnp.dtype(dtype).itemsize

    # ---- tiling / padding -------------------------------------------------
    # Lane-dense hidden dim (multiple of 128) -> unmasked vector stores.
    H_p = _round_up(H, 128)
    # Row tile: 128..512, multiple of 128 (also covers bf16 sublane packing).
    # For v7x megacore, an even N_p // tm gives a balanced 2-TC split when N
    # is large enough; tiny demos collapse to a single tile.
    tm = max(128, _round_up(min(tm, N), 128))
    N_p = _round_up(N, tm)

    # F tile sized against an explicit VMEM budget (fits v7x's 64 MiB VMEM):
    #   fixed = 2x x-tile + 2x out-tile + f32 acc + gamma/beta
    #   per tf = double-buffered W1 + W2 blocks = 2*(H_p*tf + tf*H_p)*itemsize
    fixed = (2 * tm * H_p * itemsize          # x tile, double-buffered
             + 2 * tm * H_p * itemsize        # out tile, double-buffered
             + tm * H_p * 4                   # f32 accumulator
             + 4 * H_p * itemsize)            # gamma/beta
    per_tf = 4 * H_p * itemsize
    tf_cap = max(128, ((tile_vmem_budget - fixed) // per_tf) // 128 * 128)
    tf = int(min(tf_cap, _round_up(F, 128)))
    F_p = _round_up(F, tf)

    est_vmem = fixed + per_tf * tf
    vmem_limit = int(min(max(est_vmem + 8 * 2**20, 32 * 2**20), 56 * 2**20))

    # ---- zero-pad operands (padding contributes nothing to the matmuls) ----
    xp = jnp.zeros((N_p, H_p), dtype).at[:N, :H].set(x.reshape(N, H))
    w1p = jnp.zeros((H_p, F_p), w1.dtype).at[:H, :F].set(w1)
    w2p = jnp.zeros((F_p, H_p), w2.dtype).at[:F, :H].set(w2)
    gp = jnp.zeros((1, H_p), gamma.dtype).at[0, :H].set(gamma)
    bp = jnp.zeros((1, H_p), beta.dtype).at[0, :H].set(beta)

    cost = pl.CostEstimate(
        flops=4 * N * H * F,                       # two N x H x F matmuls
        transcendentals=N,                         # rsqrt per row
        bytes_accessed=(2 * N * H + H * F + F * H) * itemsize)

    kernel = functools.partial(ffn_kernel, h_real=H)

    out = pl.pallas_call(
        kernel,
        out_shape=jax.ShapeDtypeStruct((N_p, H_p), dtype),
        grid_spec=pltpu.PrefetchScalarGridSpec(
            num_scalar_prefetch=0,
            grid=(N_p // tm, F_p // tf),               # (rows, F reduction)
            in_specs=[
                pl.BlockSpec((tm, H_p), lambda i, f: (i, 0)),   # x row tile
                pl.BlockSpec((H_p, tf), lambda i, f: (0, f)),   # W1 F-block
                pl.BlockSpec((tf, H_p), lambda i, f: (f, 0)),   # W2 F-block
                pl.BlockSpec((1, H_p), lambda i, f: (0, 0)),    # gamma
                pl.BlockSpec((1, H_p), lambda i, f: (0, 0)),    # beta
            ],
            out_specs=pl.BlockSpec((tm, H_p), lambda i, f: (i, 0)),
            scratch_shapes=[pltpu.VMEM((tm, H_p), jnp.float32)],
        ),
        compiler_params=pltpu.CompilerParams(
            dimension_semantics=("parallel", "arbitrary"),
            vmem_limit_bytes=vmem_limit),
        cost_estimate=cost,
    )(xp, w1p, w2p, gp, bp)

    return out[:N, :H].reshape(B, S, H)


def reference(x, w1, w2, gamma, beta):
    y = jnp.maximum(x @ w1, 0.0) @ w2 + x
    mean = jnp.mean(y, axis=-1, keepdims=True)
    var = jnp.mean(jnp.square(y - mean), axis=-1, keepdims=True)
    return (y - mean) * jax.lax.rsqrt(var + 1e-6) * gamma + beta


if __name__ == "__main__":
    B, S, H, F = 2, 8, 32, 64          # batch, seq, hidden_dim, ffn inner dim

    key = jax.random.PRNGKey(0)
    kx, kw1, kw2 = jax.random.split(key, 3)

    x = jax.random.normal(kx, (B, S, H), dtype=jnp.float32)
    # mlp_params[0], mlp_params[1] (passed externally in the PyTorch forward)
    w1 = jax.random.normal(kw1, (H, F), dtype=jnp.float32) * 0.1
    w2 = jax.random.normal(kw2, (F, H), dtype=jnp.float32) * 0.1
    # nn.LayerNorm(hidden_dim) default init: gamma = 1, beta = 0
    gamma = jnp.ones((H,), dtype=jnp.float32)
    beta = jnp.zeros((H,), dtype=jnp.float32)

    out = meta_positionwise_ffn(x, w1, w2, gamma, beta)
    out = jax.block_until_ready(out)

    ref = reference(x, w1, w2, gamma, beta)
    assert out.shape == (B, S, H)
    assert jnp.allclose(out, ref, atol=1e-5, rtol=1e-5), "mismatch vs reference"

    print("KERNEL_OK")
</pallas_src>

<mosaic_0001>
module attributes {stable_mosaic.version = 11 : i64} {
  func.func @ffn_kernel(%arg0: i32, %arg1: i32, %arg2: memref<128x128xf32, #tpu.memory_space<vmem>>, %arg3: memref<128x128xf32, #tpu.memory_space<vmem>>, %arg4: memref<128x128xf32, #tpu.memory_space<vmem>>, %arg5: memref<1x128xf32, #tpu.memory_space<vmem>>, %arg6: memref<1x128xf32, #tpu.memory_space<vmem>>, %arg7: memref<128x128xf32, #tpu.memory_space<vmem>>, %arg8: memref<128x128xf32, #tpu.memory_space<vmem>>) attributes {dimension_semantics = [#tpu.dimension_semantics<parallel>, #tpu.dimension_semantics<arbitrary>], iteration_bounds = array<i64: 1, 1>, scalar_prefetch = 0 : i64, scratch_operands = 1 : i64, tpu.core_type = #tpu.core_type<tc>, window_params = [{transform_indices = @transform_0, window_bounds = array<i64: 128, 128>}, {transform_indices = @transform_1, window_bounds = array<i64: 128, 128>}, {transform_indices = @transform_2, window_bounds = array<i64: 128, 128>}, {pipeline_mode = #tpu.pipeline_mode<synchronous>, transform_indices = @transform_3, window_bounds = array<i64: 1, 128>}, {pipeline_mode = #tpu.pipeline_mode<synchronous>, transform_indices = @transform_4, window_bounds = array<i64: 1, 128>}, {transform_indices = @transform_5, window_bounds = array<i64: 128, 128>}]} {
    %c0_i32 = arith.constant 0 : i32
    %0 = arith.cmpi eq, %arg1, %c0_i32 : i32
    %1 = arith.extui %0 : i1 to i32
    %c0_i32_0 = arith.constant 0 : i32
    %2 = arith.cmpi ne, %1, %c0_i32_0 : i32
    scf.if %2 {
      %cst_14 = arith.constant 0.000000e+00 : f32
      %16 = vector.broadcast %cst_14 : f32 to vector<128x128xf32>
      %c0_15 = arith.constant 0 : index
      %c0_16 = arith.constant 0 : index
      %17 = vector.load %arg8[%c0_15, %c0_16] : memref<128x128xf32, #tpu.memory_space<vmem>>, vector<128x128xf32>
      tpu.vector_store %arg8[%c0_15, %c0_16], %16 {strides = array<i32>} : memref<128x128xf32, #tpu.memory_space<vmem>>, vector<128x128xf32>,
    } else {
    }
    %c0 = arith.constant 0 : index
    %c0_1 = arith.constant 0 : index
    %3 = vector.load %arg2[%c0, %c0_1] : memref<128x128xf32, #tpu.memory_space<vmem>>, vector<128x128xf32>
    %c0_2 = arith.constant 0 : index
    %c0_3 = arith.constant 0 : index
    %4 = vector.load %arg3[%c0_2, %c0_3] : memref<128x128xf32, #tpu.memory_space<vmem>>, vector<128x128xf32>
    %cst = arith.constant dense<0.000000e+00> : vector<128x128xf32>
    %5 = tpu.matmul %3, %4, %cst {dimension_numbers = #tpu.dot_dimension_numbers<[1], [0], [0], [1], [0, 0, 1, 1], [], []>} : vector<128x128xf32>, vector<128x128xf32>, vector<128x128xf32> -> vector<128x128xf32>
    %cst_4 = arith.constant 0.000000e+00 : f32
    %6 = vector.broadcast %cst_4 : f32 to vector<128x128xf32>
    %7 = arith.maximumf %5, %6 : vector<128x128xf32>
    %c0_5 = arith.constant 0 : index
    %c0_6 = arith.constant 0 : index
    %8 = vector.load %arg8[%c0_5, %c0_6] : memref<128x128xf32, #tpu.memory_space<vmem>>, vector<128x128xf32>
    %c0_7 = arith.constant 0 : index
    %c0_8 = arith.constant 0 : index
    %9 = vector.load %arg4[%c0_7, %c0_8] : memref<128x128xf32, #tpu.memory_space<vmem>>, vector<128x128xf32>
    %cst_9 = arith.constant dense<0.000000e+00> : vector<128x128xf32>
    %10 = tpu.matmul %7, %9, %cst_9 {dimension_numbers = #tpu.dot_dimension_numbers<[1], [0], [0], [1], [0, 0, 1, 1], [], []>} : vector<128x128xf32>, vector<128x128xf32>, vector<128x128xf32> -> vector<128x128xf32>
    %11 = arith.addf %8, %10 : vector<128x128xf32>
    %c0_10 = arith.constant 0 : index
    %c0_11 = arith.constant 0 : index
    %12 = vector.load %arg8[%c0_10, %c0_11] : memref<128x128xf32, #tpu.memory_space<vmem>>, vector<128x128xf32>
    tpu.vector_store %arg8[%c0_10, %c0_11], %11 {strides = array<i32>} : memref<128x128xf32, #tpu.memory_space<vmem>>, vector<128x128xf32>,
    %c0_i32_12 = arith.constant 0 : i32
    %13 = arith.cmpi eq, %arg1, %c0_i32_12 : i32
    %14 = arith.extui %13 : i1 to i32
    %c0_i32_13 = arith.constant 0 : i32
    %15 = arith.cmpi ne, %14, %c0_i32_13 : i32
    scf.if %15 {
      %c0_14 = arith.constant 0 : index
      %c0_15 = arith.constant 0 : index
      %16 = vector.load %arg8[%c0_14, %c0_15] : memref<128x128xf32, #tpu.memory_space<vmem>>, vector<128x128xf32>
      %c0_16 = arith.constant 0 : index
      %c0_17 = arith.constant 0 : index
      %17 = vector.load %arg2[%c0_16, %c0_17] : memref<128x128xf32, #tpu.memory_space<vmem>>, vector<128x128xf32>
      %18 = arith.addf %16, %17 : vector<128x128xf32>
      %19 = tpu.iota {dimensions = array<i32: 1>} : vector<128x128xi32>
      %c32_i32 = arith.constant 32 : i32
      %20 = vector.broadcast %c32_i32 : i32 to vector<128x128xi32>
      %21 = arith.cmpi slt, %19, %20 : vector<128x128xi32>
      %cst_18 = arith.constant 0.000000e+00 : f32
      %22 = vector.broadcast %cst_18 : f32 to vector<128x128xf32>
      %23 = arith.select %21, %18, %22 : vector<128x128xi1>, vector<128x128xf32>
      %cst_19 = arith.constant dense<0.000000e+00> : vector<128xf32>
      %24 = vector.multi_reduction <add>, %23, %cst_19 [1] : vector<128x128xf32> to vector<128xf32>
      %25 = vector.shape_cast %24 : vector<128xf32> to vector<128x1xf32>
      %cst_20 = arith.constant 3.125000e-02 : f32
      %26 = vector.broadcast %cst_20 : f32 to vector<128x1xf32>
      %27 = arith.mulf %25, %26 : vector<128x1xf32>
      %28 = vector.broadcast %27 : vector<128x1xf32> to vector<128x128xf32>
      %29 = arith.subf %18, %28 : vector<128x128xf32>
      %cst_21 = arith.constant 0.000000e+00 : f32
      %30 = vector.broadcast %cst_21 : f32 to vector<128x128xf32>
      %31 = arith.select %21, %29, %30 : vector<128x128xi1>, vector<128x128xf32>
      %32 = arith.mulf %31, %31 : vector<128x128xf32>
      %cst_22 = arith.constant dense<0.000000e+00> : vector<128xf32>
      %33 = vector.multi_reduction <add>, %32, %cst_22 [1] : vector<128x128xf32> to vector<128xf32>
      %34 = vector.shape_cast %33 : vector<128xf32> to vector<128x1xf32>
      %cst_23 = arith.constant 3.125000e-02 : f32
      %35 = vector.broadcast %cst_23 : f32 to vector<128x1xf32>
      %36 = arith.mulf %34, %35 : vector<128x1xf32>
      %37 = vector.broadcast %27 : vector<128x1xf32> to vector<128x128xf32>
      %38 = arith.subf %18, %37 : vector<128x128xf32>
      %cst_24 = arith.constant 9.99999997E-7 : f32
      %39 = vector.broadcast %cst_24 : f32 to vector<128x1xf32>
      %40 = arith.addf %36, %39 : vector<128x1xf32>
      %41 = math.rsqrt %40 : vector<128x1xf32>
      %42 = vector.broadcast %41 : vector<128x1xf32> to vector<128x128xf32>
      %43 = arith.mulf %38, %42 : vector<128x128xf32>
      %c0_25 = arith.constant 0 : index
      %c0_26 = arith.constant 0 : index
      %44 = vector.load %arg5[%c0_25, %c0_26] : memref<1x128xf32, #tpu.memory_space<vmem>>, vector<1x128xf32>
      %45 = vector.broadcast %44 : vector<1x128xf32> to vector<128x128xf32>
      %46 = arith.mulf %43, %45 : vector<128x128xf32>
      %c0_27 = arith.constant 0 : index
      %c0_28 = arith.constant 0 : index
      %47 = vector.load %arg6[%c0_27, %c0_28] : memref<1x128xf32, #tpu.memory_space<vmem>>, vector<1x128xf32>
      %48 = vector.broadcast %47 : vector<1x128xf32> to vector<128x128xf32>
      %49 = arith.addf %46, %48 : vector<128x128xf32>
      %c0_29 = arith.constant 0 : index
      %c0_30 = arith.constant 0 : index
      %50 = vector.load %arg7[%c0_29, %c0_30] : memref<128x128xf32, #tpu.memory_space<vmem>>, vector<128x128xf32>
      tpu.vector_store %arg7[%c0_29, %c0_30], %49 {strides = array<i32>} : memref<128x128xf32, #tpu.memory_space<vmem>>, vector<128x128xf32>,
    } else {
    }
    return
  }
  func.func @transform_0(%arg0: i32, %arg1: i32) -> (i32, i32) {
    %c0_i32 = arith.constant 0 : i32
    %c0_i32_0 = arith.constant 0 : i32
    return %arg0, %c0_i32 : i32, i32
  }
  func.func @transform_1(%arg0: i32, %arg1: i32) -> (i32, i32) {
    %c0_i32 = arith.constant 0 : i32
    %c0_i32_0 = arith.constant 0 : i32
    return %c0_i32, %arg1 : i32, i32
  }
  func.func @transform_2(%arg0: i32, %arg1: i32) -> (i32, i32) {
    %c0_i32 = arith.constant 0 : i32
    %c0_i32_0 = arith.constant 0 : i32
    return %arg1, %c0_i32 : i32, i32
  }
  func.func @transform_3(%arg0: i32, %arg1: i32) -> (i32, i32) {
    %c0_i32 = arith.constant 0 : i32
    %c0_i32_0 = arith.constant 0 : i32
    %c0_i32_1 = arith.constant 0 : i32
    return %c0_i32, %c0_i32_0 : i32, i32
  }
  func.func @transform_4(%arg0: i32, %arg1: i32) -> (i32, i32) {
    %c0_i32 = arith.constant 0 : i32
    %c0_i32_0 = arith.constant 0 : i32
    %c0_i32_1 = arith.constant 0 : i32
    return %c0_i32, %c0_i32_0 : i32, i32
  }
  func.func @transform_5(%arg0: i32, %arg1: i32) -> (i32, i32) {
    %c0_i32 = arith.constant 0 : i32
    %c0_i32_0 = arith.constant 0 : i32
    return %arg0, %c0_i32 : i32, i32
  }
}

</mosaic_0001>

<bundles_post_ra>
// kernel: tpu_custom_call.1
= control target key start
LH: loop header
LB: loop body
LE: loop exit
PB: predicated region body
PF: predicated region fallthrough
CT: control target
= control target key end

     0   :  { %10 = vsyncpa [#allocation4], 0  ;;  %s1403_s0 = inlined_call_operand.hbm [shape: f32[128,128], index: 0, kind: input, shape index: {}]   ;;  %s1404_s1 = inlined_call_operand.hbm [shape: f32[128,128], index: 1, kind: input, shape index: {}]   ;;  %s1405_s2 = inlined_call_operand.hbm [shape: f32[128,128], index: 2, kind: input, shape index: {}]   ;;  %s1406_s3 = inlined_call_operand.vmem [shape: f32[1,128], index: 3, kind: input, shape index: {}]   ;;  %s1407_s4 = inlined_call_operand.vmem [shape: f32[1,128], index: 4, kind: input, shape index: {}]   ;;  %s1408_s5 = inlined_call_operand.hbm [shape: f32[128,128], index: 5, kind: output, shape index: {}]  }
   0x1   :  { %11 = vsyncpa [#allocation7], 0 }
   0x2   :  { %12 = vsyncpa [#allocation5], 0  ;;  %s30_s20 = sshll.u32 %s1404_s1, 4  ;;  %s986_s21 = smov [#allocation6]   ;;  %s31_s20 = int_to_ptr.hbm [resolvable:$true] %s30_s20 }
   0x3   :  { %s32_s22 = sshll.u32 %s986_s21, 4  ;;  %s17_s25 = sshll.u32 %s1403_s0, 4  ;;  %s33_s22 = int_to_ptr.vmem [resolvable:$true] %s32_s22  ;;  %s18_s25 = int_to_ptr.hbm [resolvable:$true] %s17_s25 }
   0x4   :  { %s987_s26 = smov 128   ;;  %s988_s27 = smov 8  }
   0x5   :  { %38 = dma.hbm_to_vmem [thread:$0]  %s31_s20, 2048, %s33_s22, [#allocation7], %s987_s26, %s987_s26, %s988_s27  }
   0x6   :  { %s989_s28 = smov [#allocation3]   ;;  %s43_s1 = sshll.u32 %s1405_s2, 4  ;;  %s44_s1 = int_to_ptr.hbm [resolvable:$true] %s43_s1 }
   0x7   :  { %s19_s29 = sshll.u32 %s989_s28, 4  ;;  %s990_s0 = smov [#allocation8]   ;;  %s20_s29 = int_to_ptr.vmem [resolvable:$true] %s19_s29 }
   0x8   :  { %25 = dma.hbm_to_vmem [thread:$0]  %s18_s25, 2048, %s20_s29, [#allocation4], %s987_s26, %s987_s26, %s988_s27  }
   0x9   :  { %s45_s7 = sshll.u32 %s990_s0, 4  ;;  %s46_s7 = int_to_ptr.vmem [resolvable:$true] %s45_s7 }
   0xa   :  { %51 = dma.hbm_to_vmem [thread:$0]  %s44_s1, 2048, %s46_s7, [#allocation7], %s987_s26, %s987_s26, %s988_s27  }
   0xb   :  { %980 = dma.done.wait [#allocation4], 2048  }
   0xc   :  { %981 = vsyncadd [#allocation4], 4294965248 }
   0xd   :  { %982 = dma.done.wait [#allocation7], 4096  }
   0xe   :  { %983 = vsyncadd [#allocation7], 4294963200  ;;  %v119_v0 = vld [vmem:[#allocation6 + $0x78] sm:$0xff]  ;;  %v118_v1 = vld [vmem:[#allocation6 + $0x70] sm:$0xff]  ;;  %s798_s13 = sshll.u32 %s1408_s5, 4  ;;  %s799_s13 = int_to_ptr.hbm [resolvable:$true] %s798_s13 }
   0xf   :  { %120 = vmatpush.msra.mxu0 %v119_v0  ;;  %812 = vmatpush.msra.mxu2 %v119_v0  ;;  %v117_v2 = vld [vmem:[#allocation6 + $0x68] sm:$0xff]  ;;  %v116_v3 = vld [vmem:[#allocation6 + $0x60] sm:$0xff]  ;;  %v115_v4 = vld [vmem:[#allocation6 + $0x58] sm:$0xff] }
  0x10   :  { %v114_v5 = vld [vmem:[#allocation6 + $0x50] sm:$0xff]  ;;  %v113_v6 = vld [vmem:[#allocation6 + $0x48] sm:$0xff]  ;;  %v112_v7 = vld [vmem:[#allocation6 + $0x40] sm:$0xff] }
  0x11   :  { %121 = vmatpush.msra.mxu0 %v118_v1  ;;  %813 = vmatpush.msra.mxu2 %v118_v1  ;;  %v111_v8 = vld [vmem:[#allocation6 + $0x38] sm:$0xff]  ;;  %v110_v9 = vld [vmem:[#allocation6 + $0x30] sm:$0xff]  ;;  %v109_v10 = vld [vmem:[#allocation6 + $0x28] sm:$0xff] }
  0x12   :  { %v108_v11 = vld [vmem:[#allocation6 + $0x20] sm:$0xff]  ;;  %v107_v12 = vld [vmem:[#allocation6 + $0x18] sm:$0xff]  ;;  %v106_v13 = vld [vmem:[#allocation6 + $0x10] sm:$0xff] }
  0x13   :  { %122 = vmatpush.msra.mxu0 %v117_v2  ;;  %814 = vmatpush.msra.mxu2 %v117_v2  ;;  %v105_v14 = vld [vmem:[#allocation6 + $0x8] sm:$0xff]  ;;  %v104_v15 = vld [vmem:[#allocation6] sm:$0xff]  ;;  %v1052_v20 = vld [vmem:[#allocation3 + $0x10] sm:$0xff] }
  0x14   :  { %v1040_v16 = vld [vmem:[#allocation3] sm:$0xff]  ;;  %v1046_v18 = vld [vmem:[#allocation3 + $0x8] sm:$0xff]  ;;  %v1054_v21 = vld [vmem:[#allocation3 + $0x50] sm:$0xff] }
  0x15   :  { %123 = vmatpush.msra.mxu0 %v116_v3  ;;  %815 = vmatpush.msra.mxu2 %v116_v3  ;;  %v1042_v17 = vld [vmem:[#allocation3 + $0x40] sm:$0xff]  ;;  %v1048_v19 = vld [vmem:[#allocation3 + $0x48] sm:$0xff]  ;;  %v1058_v22 = vld [vmem:[#allocation3 + $0x18] sm:$0xff] }
  0x16   :  { %v1060_v23 = vld [vmem:[#allocation3 + $0x58] sm:$0xff]  ;;  %v231_v25 = vld [vmem:[#allocation8 + $0x70] sm:$0xff]  ;;  %v230_v26 = vld [vmem:[#allocation8 + $0x68] sm:$0xff] }
  0x17   :  { %124 = vmatpush.msra.mxu0 %v115_v4  ;;  %816 = vmatpush.msra.mxu2 %v115_v4  ;;  %v232_v24 = vld [vmem:[#allocation8 + $0x78] sm:$0xff]  ;;  %v229_v27 = vld [vmem:[#allocation8 + $0x60] sm:$0xff]  ;;  %v227_v31 = vld [vmem:[#allocation8 + $0x50] sm:$0xff] }
  0x18   :  { %233 = vmatpush.msra.mxu1 %v232_v24  ;;  %828 = vmatpush.msra.mxu3 %v232_v24  ;;  %v1064_v28 = vld [vmem:[#allocation3 + $0x20] sm:$0xff]  ;;  %v228_v30 = vld [vmem:[#allocation8 + $0x58] sm:$0xff]  ;;  %v226_v32 = vld [vmem:[#allocation8 + $0x48] sm:$0xff]  ;;  %v381_v24 = vlaneseq }
  0x19   :  { %125 = vmatpush.msra.mxu0 %v114_v5  ;;  %817 = vmatpush.msra.mxu2 %v114_v5  ;;  %v1066_v29 = vld [vmem:[#allocation3 + $0x60] sm:$0xff]  ;;  %v1070_v34 = vld [vmem:[#allocation3 + $0x68] sm:$0xff]  ;;  %v224_v36 = vld [vmem:[#allocation8 + $0x38] sm:$0xff] }
  0x1a   :  { %234 = vmatpush.msra.mxu1 %v231_v25  ;;  %829 = vmatpush.msra.mxu3 %v231_v25  ;;  %v225_v33 = vld [vmem:[#allocation8 + $0x40] sm:$0xff]  ;;  %v1072_v35 = vld [vmem:[#allocation3 + $0x28] sm:$0xff]  ;;  %v223_v37 = vld [vmem:[#allocation8 + $0x30] sm:$0xff]  ;;  %v1088_v25 = vand.u32 127, %v381_v24 }
  0x1b   :  { %126 = vmatpush.msra.mxu0 %v113_v6  ;;  %818 = vmatpush.msra.mxu2 %v113_v6  ;;  %v222_v38 = vld [vmem:[#allocation8 + $0x28] sm:$0xff]  ;;  %v221_v39 = vld [vmem:[#allocation8 + $0x20] sm:$0xff]  ;;  %v1076_v40 = vld [vmem:[#allocation3 + $0x70] sm:$0xff] }
  0x1c   :  { %235 = vmatpush.msra.mxu1 %v230_v26  ;;  %830 = vmatpush.msra.mxu3 %v230_v26  ;;  %v1078_v41 = vld [vmem:[#allocation3 + $0x30] sm:$0xff]  ;;  %v220_v42 = vld [vmem:[#allocation8 + $0x18] sm:$0xff]  ;;  %v218_v46 = vld [vmem:[#allocation8 + $0x8] sm:$0xff]  ;;  %vm383_vm0 = vcmp.lt.s32.totalorder %v1088_v25, 32 }
  0x1d   :  { %127 = vmatpush.msra.mxu0 %v112_v7  ;;  %819 = vmatpush.msra.mxu2 %v112_v7  ;;  %v219_v43 = vld [vmem:[#allocation8 + $0x10] sm:$0xff]  ;;  %v1082_v44 = vld [vmem:[#allocation3 + $0x78] sm:$0xff]  ;;  %v217_v47 = vld [vmem:[#allocation8] sm:$0xff] }
  0x1e   :  { %236 = vmatpush.msra.mxu1 %v229_v27  ;;  %831 = vmatpush.msra.mxu3 %v229_v27  ;;  %v1084_v45 = vld [vmem:[#allocation3 + $0x38] sm:$0xff] }
  0x1f   :  { %128 = vmatpush.msra.mxu0 %v111_v8  ;;  %820 = vmatpush.msra.mxu2 %v111_v8 }
  0x20   :  { %237 = vmatpush.msra.mxu1 %v228_v30  ;;  %832 = vmatpush.msra.mxu3 %v228_v30 }
  0x21   :  { %129 = vmatpush.msra.mxu0 %v110_v9  ;;  %821 = vmatpush.msra.mxu2 %v110_v9 }
  0x22   :  { %238 = vmatpush.msra.mxu1 %v227_v31  ;;  %833 = vmatpush.msra.mxu3 %v227_v31 }
  0x23   :  { %130 = vmatpush.msra.mxu0 %v109_v10  ;;  %822 = vmatpush.msra.mxu2 %v109_v10 }
  0x24   :  { %239 = vmatpush.msra.mxu1 %v226_v32  ;;  %834 = vmatpush.msra.mxu3 %v226_v32 }
  0x25   :  { %131 = vmatpush.msra.mxu0 %v108_v11  ;;  %823 = vmatpush.msra.mxu2 %v108_v11 }
  0x26   :  { %240 = vmatpush.msra.mxu1 %v225_v33  ;;  %835 = vmatpush.msra.mxu3 %v225_v33 }
  0x27   :  { %132 = vmatpush.msra.mxu0 %v107_v12  ;;  %824 = vmatpush.msra.mxu2 %v107_v12 }
  0x28   :  { %241 = vmatpush.msra.mxu1 %v224_v36  ;;  %836 = vmatpush.msra.mxu3 %v224_v36 }
  0x29   :  { %133 = vmatpush.msra.mxu0 %v106_v13  ;;  %825 = vmatpush.msra.mxu2 %v106_v13 }
  0x2a   :  { %242 = vmatpush.msra.mxu1 %v223_v37  ;;  %837 = vmatpush.msra.mxu3 %v223_v37 }
  0x2b   :  { %134 = vmatpush.msra.mxu0 %v105_v14  ;;  %826 = vmatpush.msra.mxu2 %v105_v14 }
  0x2c   :  { %243 = vmatpush.msra.mxu1 %v222_v38  ;;  %838 = vmatpush.msra.mxu3 %v222_v38 }
  0x2d   :  { %135 = vmatpush.msra.mxu0 %v104_v15  ;;  %827 = vmatpush.msra.mxu2 %v104_v15 }
  0x2e   :  { %136 = vmatmul.f32.vlgmr.msra.gmra.mxu0 %v1040_v16  ;;  %160 = vmatmul.f32.vlgmr.msra.gmra.mxu2 %v1042_v17 }
  0x2f   :  { %244 = vmatpush.msra.mxu1 %v221_v39  ;;  %839 = vmatpush.msra.mxu3 %v221_v39 }
  0x31   :  { %245 = vmatpush.msra.mxu1 %v220_v42  ;;  %840 = vmatpush.msra.mxu3 %v220_v42 }
  0x33   :  { %246 = vmatpush.msra.mxu1 %v219_v43  ;;  %841 = vmatpush.msra.mxu3 %v219_v43 }
  0x35   :  { %247 = vmatpush.msra.mxu1 %v218_v46  ;;  %842 = vmatpush.msra.mxu3 %v218_v46 }
  0x36   :  { %139 = vmatmul.f32.gmra.mxu0 %v1046_v18  ;;  %163 = vmatmul.f32.gmra.mxu2 %v1048_v19 }
  0x37   :  { %248 = vmatpush.msra.mxu1 %v217_v47  ;;  %843 = vmatpush.msra.mxu3 %v217_v47 }
  0x3e   :  { %142 = vmatmul.f32.gmra.mxu0 %v1052_v20  ;;  %166 = vmatmul.f32.gmra.mxu2 %v1054_v21 }
  0x46   :  { %145 = vmatmul.f32.gmra.mxu0 %v1058_v22  ;;  %169 = vmatmul.f32.gmra.mxu2 %v1060_v23 }
  0x4e   :  { %148 = vmatmul.f32.gmra.mxu0 %v1064_v28  ;;  %172 = vmatmul.f32.gmra.mxu2 %v1066_v29 }
  0x56   :  { %175 = vmatmul.f32.gmra.mxu2 %v1070_v34  ;;  %151 = vmatmul.f32.gmra.mxu0 %v1072_v35 }
  0x5e   :  { %178 = vmatmul.f32.gmra.mxu2 %v1076_v40  ;;  %154 = vmatmul.f32.gmra.mxu0 %v1078_v41 }
  0x66   :  { %181 = vmatmul.f32.gmra.mxu2 %v1082_v44  ;;  %157 = vmatmul.f32.gmra.mxu0 %v1084_v45 }
  0xab   :  { %v137_v48 = vpop.f32.mrf.mxu0 }
  0xac   :  { %v185_v49 = vmax.f32 %v137_v48, 0.0 }
  0xae   :  { %249 = vmatmul.f32.vlgmr.msra.gmra.mxu1 %v185_v49 }
  0xb1   :  { %v161_v50 = vpop.f32.mrf.mxu2 }
  0xb2   :  { %v193_v51 = vmax.f32 %v161_v50, 0.0 }
  0xb3   :  { %v140_v52 = vpop.f32.mrf.mxu0 }
  0xb4   :  { %v186_v53 = vmax.f32 %v140_v52, 0.0  ;;  %273 = vmatmul.f32.vlgmr.msra.gmra.mxu3 %v193_v51 }
  0xb6   :  { %252 = vmatmul.f32.gmra.mxu1 %v186_v53 }
  0xb9   :  { %v164_v54 = vpop.f32.mrf.mxu2 }
  0xba   :  { %v194_v55 = vmax.f32 %v164_v54, 0.0 }
  0xbb   :  { %v143_v56 = vpop.f32.mrf.mxu0 }
  0xbc   :  { %v187_v57 = vmax.f32 %v143_v56, 0.0  ;;  %276 = vmatmul.f32.gmra.mxu3 %v194_v55 }
  0xbe   :  { %255 = vmatmul.f32.gmra.mxu1 %v187_v57 }
  0xc1   :  { %v167_v58 = vpop.f32.mrf.mxu2 }
  0xc2   :  { %v195_v59 = vmax.f32 %v167_v58, 0.0 }
  0xc3   :  { %v146_v60 = vpop.f32.mrf.mxu0 }
  0xc4   :  { %v188_v61 = vmax.f32 %v146_v60, 0.0  ;;  %279 = vmatmul.f32.gmra.mxu3 %v195_v59 }
  0xc6   :  { %258 = vmatmul.f32.gmra.mxu1 %v188_v61 }
  0xc9   :  { %v170_v62 = vpop.f32.mrf.mxu2 }
  0xca   :  { %v196_v63 = vmax.f32 %v170_v62, 0.0 }
  0xcb   :  { %v149_v0 = vpop.f32.mrf.mxu0 }
  0xcc   :  { %v189_v1 = vmax.f32 %v149_v0, 0.0  ;;  %282 = vmatmul.f32.gmra.mxu3 %v196_v63 }
  0xce   :  { %261 = vmatmul.f32.gmra.mxu1 %v189_v1 }
  0xd1   :  { %v173_v2 = vpop.f32.mrf.mxu2 }
  0xd2   :  { %v197_v3 = vmax.f32 %v173_v2, 0.0 }
  0xd3   :  { %v152_v4 = vpop.f32.mrf.mxu0 }
  0xd4   :  { %285 = vmatmul.f32.gmra.mxu3 %v197_v3  ;;  %v190_v5 = vmax.f32 %v152_v4, 0.0 }
  0xd6   :  { %264 = vmatmul.f32.gmra.mxu1 %v190_v5 }
  0xd9   :  { %v176_v6 = vpop.f32.mrf.mxu2 }
  0xda   :  { %v198_v7 = vmax.f32 %v176_v6, 0.0 }
  0xdb   :  { %v155_v8 = vpop.f32.mrf.mxu0 }
  0xdc   :  { %288 = vmatmul.f32.gmra.mxu3 %v198_v7  ;;  %v191_v9 = vmax.f32 %v155_v8, 0.0 }
  0xde   :  { %267 = vmatmul.f32.gmra.mxu1 %v191_v9 }
  0xe1   :  { %v179_v10 = vpop.f32.mrf.mxu2 }
  0xe2   :  { %v199_v11 = vmax.f32 %v179_v10, 0.0 }
  0xe3   :  { %v158_v12 = vpop.f32.mrf.mxu0 }
  0xe4   :  { %291 = vmatmul.f32.gmra.mxu3 %v199_v11  ;;  %v192_v13 = vmax.f32 %v158_v12, 0.0 }
  0xe6   :  { %270 = vmatmul.f32.gmra.mxu1 %v192_v13 }
  0xe9   :  { %v182_v14 = vpop.f32.mrf.mxu2 }
  0xea   :  { %v200_v15 = vmax.f32 %v182_v14, 0.0 }
  0xec   :  { %294 = vmatmul.f32.gmra.mxu3 %v200_v15 }
 0x12b   :  { %v250_v26 = vpop.f32.mrf.mxu1 }
 0x12c   :  { %v1092_v27 = vadd.f32 %v250_v26, %v1040_v16 }
 0x12e   :  { %v384_v30 = vsel %vm383_vm0, %v1092_v27, 0.0 }
 0x12f   :  { %400 = vadd.xlane.f32.xlu0 %v384_v30 }
 0x133   :  { %v253_v31 = vpop.f32.mrf.mxu1 }
 0x134   :  { %v1098_v32 = vadd.f32 %v253_v31, %v1046_v18 }
 0x136   :  { %v385_v33 = vsel %vm383_vm0, %v1098_v32, 0.0 }
 0x137   :  { %v274_v36 = vpop.f32.mrf.mxu3  ;;  %402 = vadd.xlane.f32.xlu0 %v385_v33 }
 0x138   :  { %v1104_v37 = vadd.f32 %v274_v36, %v1042_v17 }
 0x13a   :  { %v392_v16 = vsel %vm383_vm0, %v1104_v37, 0.0 }
 0x13b   :  { %416 = vadd.xlane.f32.xlu2 %v392_v16  ;;  %v256_v38 = vpop.f32.mrf.mxu1 }
 0x13c   :  { %v1110_v39 = vadd.f32 %v256_v38, %v1052_v20 }
 0x13e   :  { %v386_v18 = vsel %vm383_vm0, %v1110_v39, 0.0 }
 0x13f   :  { %v277_v42 = vpop.f32.mrf.mxu3  ;;  %404 = vadd.xlane.f32.xlu1 %v386_v18 }
 0x140   :  { %v1116_v43 = vadd.f32 %v277_v42, %v1048_v19 }
 0x142   :  { %v393_v17 = vsel %vm383_vm0, %v1116_v43, 0.0 }
 0x143   :  { %418 = vadd.xlane.f32.xlu0 %v393_v17  ;;  %v259_v46 = vpop.f32.mrf.mxu1 }
 0x144   :  { %v1122_v47 = vadd.f32 %v259_v46, %v1058_v22 }
 0x146   :  { %v387_v20 = vsel %vm383_vm0, %v1122_v47, 0.0 }
 0x147   :  { %v280_v48 = vpop.f32.mrf.mxu3  ;;  %406 = vadd.xlane.f32.xlu1 %v387_v20 }
 0x148   :  { %v1128_v49 = vadd.f32 %v280_v48, %v1054_v21 }
 0x14a   :  { %v394_v51 = vsel %vm383_vm0, %v1128_v49, 0.0 }
 0x14b   :  { %v262_v19 = vpop.f32.mrf.mxu1 }
 0x14c   :  { %v1131_v50 = vadd.f32 %v262_v19, %v1064_v28 }
 0x14e   :  { %v388_v22 = vsel %vm383_vm0, %v1131_v50, 0.0 }
 0x14f   :  { %v283_v52 = vpop.f32.mrf.mxu3  ;;  %420 = vadd.xlane.f32.xlu1 %v394_v51  ;;  %408 = vadd.xlane.f32.xlu2 %v388_v22 }
 0x150   :  { %v1140_v53 = vadd.f32 %v283_v52, %v1060_v23 }
 0x152   :  { %v395_v28 = vsel %vm383_vm0, %v1140_v53, 0.0 }
 0x153   :  { %v265_v21 = vpop.f32.mrf.mxu1 }
 0x154   :  { %v1149_v56 = vadd.f32 %v265_v21, %v1072_v35 }
 0x156   :  { %v389_v59 = vsel %vm383_vm0, %v1149_v56, 0.0 }
 0x157   :  { %v286_v54 = vpop.f32.mrf.mxu3  ;;  %422 = vadd.xlane.f32.xlu2 %v395_v28 }
 0x158   :  { %v1146_v55 = vadd.f32 %v286_v54, %v1066_v29 }
 0x15a   :  { %v396_v57 = vsel %vm383_vm0, %v1146_v55, 0.0 }
 0x15b   :  { %424 = vadd.xlane.f32.xlu0 %v396_v57  ;;  %v268_v23 = vpop.f32.mrf.mxu1 }
 0x15c   :  { %v1155_v58 = vadd.f32 %v268_v23, %v1078_v41 }
 0x15e   :  { %v390_v35 = vsel %vm383_vm0, %v1155_v58, 0.0 }
 0x15f   :  { %v289_v60 = vpop.f32.mrf.mxu3  ;;  %410 = vadd.xlane.f32.xlu2 %v389_v59 }
 0x160   :  { %v1161_v29 = vadd.f32 %v289_v60, %v1070_v34 }
 0x162   :  { %v397_v61 = vsel %vm383_vm0, %v1161_v29, 0.0 }
 0x163   :  { %426 = vadd.xlane.f32.xlu1 %v397_v61  ;;  %412 = vadd.xlane.f32.xlu0 %v390_v35  ;;  %v271_v41 = vpop.f32.mrf.mxu1 }
 0x164   :  { %v1170_v62 = vadd.f32 %v271_v41, %v1084_v45 }
 0x166   :  { %v391_v34 = vsel %vm383_vm0, %v1170_v62, 0.0 }
 0x167   :  { %v292_v63 = vpop.f32.mrf.mxu3 }
 0x168   :  { %v1173_v0 = vadd.f32 %v292_v63, %v1076_v40 }
 0x16a   :  { %v398_v1 = vsel %vm383_vm0, %v1173_v0, 0.0 }
 0x16b   :  { %428 = vadd.xlane.f32.xlu2 %v398_v1  ;;  %414 = vadd.xlane.f32.xlu1 %v391_v34 }
 0x16f   :  { %v295_v2 = vpop.f32.mrf.mxu3 }
 0x170   :  { %v1182_v3 = vadd.f32 %v295_v2, %v1082_v44 }
 0x172   :  { %v399_v45 = vsel %vm383_vm0, %v1182_v3, 0.0 }
 0x173   :  { %430 = vadd.xlane.f32.xlu0 %v399_v45 }
 0x1a2   :  { %v401_v40 = vpop.xlane.xlu0 %400 }
 0x1a3   :  { %v432_v4 = vmul.f32 0.03125, %v401_v40 }
 0x1a5   :  { %v1188_v5 = vsub.f32 %v1092_v27, %v432_v4 }
 0x1a7   :  { %v464_v6 = vsel %vm383_vm0, %v1188_v5, 0.0 }
 0x1a8   :  { %v480_v7 = vmul.f32 %v464_v6, %v464_v6 }
 0x1aa   :  { %v403_v8 = vpop.xlane.xlu0 %402  ;;  %496 = vadd.xlane.f32.xlu1 %v480_v7 }
 0x1ab   :  { %v433_v9 = vmul.f32 0.03125, %v403_v8 }
 0x1ad   :  { %v1194_v44 = vsub.f32 %v1098_v32, %v433_v9 }
 0x1ae   :  { %v417_v10 = vpop.xlane.xlu2 %416 }
 0x1af   :  { %v440_v11 = vmul.f32 0.03125, %v417_v10  ;;  %v465_v12 = vsel %vm383_vm0, %v1194_v44, 0.0 }
 0x1b0   :  { %v481_v13 = vmul.f32 %v465_v12, %v465_v12 }
 0x1b1   :  { %v1200_v14 = vsub.f32 %v1104_v37, %v440_v11 }
 0x1b2   :  { %v405_v15 = vpop.xlane.xlu1 %404  ;;  %498 = vadd.xlane.f32.xlu2 %v481_v13 }
 0x1b3   :  { %v434_v24 = vmul.f32 0.03125, %v405_v15  ;;  %v472_v26 = vsel %vm383_vm0, %v1200_v14, 0.0 }
 0x1b4   :  { %v488_v27 = vmul.f32 %v472_v26, %v472_v26 }
 0x1b5   :  { %v1206_v30 = vsub.f32 %v1110_v39, %v434_v24 }
 0x1b6   :  { %v419_v31 = vpop.xlane.xlu0 %418  ;;  %512 = vadd.xlane.f32.xlu0 %v488_v27 }
 0x1b7   :  { %v441_v32 = vmul.f32 0.03125, %v419_v31  ;;  %v466_v36 = vsel %vm383_vm0, %v1206_v30, 0.0 }
 0x1b8   :  { %v482_v18 = vmul.f32 %v466_v36, %v466_v36 }
 0x1b9   :  { %v1209_v33 = vsub.f32 %v1116_v43, %v441_v32 }
 0x1ba   :  { %v407_v37 = vpop.xlane.xlu1 %406 }
 0x1bb   :  { %v435_v16 = vmul.f32 0.03125, %v407_v37  ;;  %v473_v38 = vsel %vm383_vm0, %v1209_v33, 0.0 }
 0x1bc   :  { %v489_v42 = vmul.f32 %v473_v38, %v473_v38 }
 0x1bd   :  { %v1218_v39 = vsub.f32 %v1122_v47, %v435_v16 }
 0x1be   :  { %500 = vadd.xlane.f32.xlu0 %v482_v18  ;;  %514 = vadd.xlane.f32.xlu1 %v489_v42 }
 0x1bf   :  { %v467_v43 = vsel %vm383_vm0, %v1218_v39, 0.0 }
 0x1c0   :  { %v483_v48 = vmul.f32 %v467_v43, %v467_v43 }
 0x1c2   :  { %v421_v17 = vpop.xlane.xlu1 %420  ;;  %v409_v46 = vpop.xlane.xlu2 %408 }
 0x1c3   :  { %v442_v20 = vmul.f32 0.03125, %v421_v17  ;;  %v436_v51 = vmul.f32 0.03125, %v409_v46 }
 0x1c5   :  { %v1224_v19 = vsub.f32 %v1128_v49, %v442_v20  ;;  %v1230_v52 = vsub.f32 %v1131_v50, %v436_v51 }
 0x1c6   :  { %502 = vadd.xlane.f32.xlu1 %v483_v48 }
 0x1c7   :  { %v474_v47 = vsel %vm383_vm0, %v1224_v19, 0.0  ;;  %v468_v49 = vsel %vm383_vm0, %v1230_v52, 0.0 }
 0x1c8   :  { %v490_v22 = vmul.f32 %v474_v47, %v474_v47  ;;  %v484_v60 = vmul.f32 %v468_v49, %v468_v49 }
 0x1ca   :  { %v423_v21 = vpop.xlane.xlu2 %422  ;;  %516 = vadd.xlane.f32.xlu2 %v490_v22 }
 0x1cb   :  { %v443_v28 = vmul.f32 0.03125, %v423_v21 }
 0x1cd   :  { %v1233_v54 = vsub.f32 %v1140_v53, %v443_v28 }
 0x1ce   :  { %v425_v57 = vpop.xlane.xlu0 %424 }
 0x1cf   :  { %v444_v23 = vmul.f32 0.03125, %v425_v57  ;;  %v475_v59 = vsel %vm383_vm0, %v1233_v54, 0.0 }
 0x1d0   :  { %v491_v35 = vmul.f32 %v475_v59, %v475_v59  ;;  %v1286_v59 = vld [vmem:[%s1406_s3] ss:$0 sm:$0xff]  ;;  %s991_s3 = smov [#allocation9]  }
 0x1d1   :  { %v1242_v50 = vsub.f32 %v1146_v55, %v444_v23 }
 0x1d2   :  { %504 = vadd.xlane.f32.xlu2 %v484_v60  ;;  %v411_v61 = vpop.xlane.xlu2 %410  ;;  %518 = vadd.xlane.f32.xlu0 %v491_v35 }
 0x1d3   :  { %v437_v53 = vmul.f32 0.03125, %v411_v61  ;;  %v476_v41 = vsel %vm383_vm0, %v1242_v50, 0.0 }
 0x1d4   :  { %v492_v63 = vmul.f32 %v476_v41, %v476_v41 }
 0x1d5   :  { %v1248_v34 = vsub.f32 %v1149_v56, %v437_v53 }
 0x1d6   :  { %v427_v1 = vpop.xlane.xlu1 %426  ;;  %v413_v2 = vpop.xlane.xlu0 %412  ;;  %520 = vadd.xlane.f32.xlu1 %v492_v63  ;;  %v1291_v63 = vld [vmem:[%s1407_s4] ss:$0 sm:$0xff]  ;;  %s796_s4 = sshll.u32 %s991_s3, 4  ;;  %s797_s4 = int_to_ptr.vmem [resolvable:$true] %s796_s4 }
 0x1d7   :  { %v438_v45 = vmul.f32 0.03125, %v413_v2  ;;  %v469_v55 = vsel %vm383_vm0, %v1248_v34, 0.0  ;;  %v445_v11 = vmul.f32 0.03125, %v427_v1 }
 0x1d8   :  { %v485_v40 = vmul.f32 %v469_v55, %v469_v55 }
 0x1d9   :  { %v1254_v4 = vsub.f32 %v1155_v58, %v438_v45  ;;  %v1272_v27 = vsub.f32 %v1161_v29, %v445_v11 }
 0x1da   :  { %506 = vadd.xlane.f32.xlu0 %v485_v40 }
 0x1db   :  { %v470_v6 = vsel %vm383_vm0, %v1254_v4, 0.0  ;;  %v477_v32 = vsel %vm383_vm0, %v1272_v27, 0.0 }
 0x1dc   :  { %v486_v7 = vmul.f32 %v470_v6, %v470_v6  ;;  %v493_v16 = vmul.f32 %v477_v32, %v477_v32 }
 0x1de   :  { %v429_v56 = vpop.xlane.xlu2 %428  ;;  %508 = vadd.xlane.f32.xlu1 %v486_v7  ;;  %v415_v8 = vpop.xlane.xlu1 %414 }
 0x1df   :  { %v446_v9 = vmul.f32 0.03125, %v429_v56  ;;  %v439_v10 = vmul.f32 0.03125, %v415_v8 }
 0x1e1   :  { %v1260_v12 = vsub.f32 %v1173_v0, %v446_v9  ;;  %v1263_v13 = vsub.f32 %v1170_v62, %v439_v10 }
 0x1e3   :  { %v478_v58 = vsel %vm383_vm0, %v1260_v12, 0.0  ;;  %v471_v15 = vsel %vm383_vm0, %v1263_v13, 0.0 }
 0x1e4   :  { %v494_v24 = vmul.f32 %v478_v58, %v478_v58  ;;  %v487_v26 = vmul.f32 %v471_v15, %v471_v15 }
 0x1e6   :  { %524 = vadd.xlane.f32.xlu0 %v494_v24  ;;  %v431_v31 = vpop.xlane.xlu0 %430  ;;  %510 = vadd.xlane.f32.xlu2 %v487_v26 }
 0x1e7   :  { %v447_v0 = vmul.f32 0.03125, %v431_v31 }
 0x1e9   :  { %v1275_v62 = vsub.f32 %v1182_v3, %v447_v0 }
 0x1eb   :  { %v479_v36 = vsel %vm383_vm0, %v1275_v62, 0.0 }
 0x1ec   :  { %v495_v37 = vmul.f32 %v479_v36, %v479_v36 }
 0x1ee   :  { %526 = vadd.xlane.f32.xlu1 %v495_v37  ;;  %522 = vadd.xlane.f32.xlu2 %v493_v16 }
 0x21d   :  { %v497_v29 = vpop.xlane.xlu1 %496 }
 0x21e   :  { %v528_v38 = vmul.f32 0.03125, %v497_v29 }
 0x220   :  { %v544_v18 = vadd.f32 1e-06, %v528_v38 }
 0x222   :  { %852 = vrsqrt.f32 %v544_v18  ;;  %vm566_vm2 = vweird.f32 %v544_v18 }
 0x225   :  { %v499_v42 = vpop.xlane.xlu2 %498 }
 0x226   :  { %v529_v43 = vmul.f32 0.03125, %v499_v42 }
 0x228   :  { %v853_v3 = vpop.eup %852  ;;  %v545_v17 = vadd.f32 1e-06, %v529_v43 }
 0x229   :  { %v561_v46 = vmul.f32 %v853_v3, %v544_v18  ;;  %v513_v20 = vpop.xlane.xlu0 %512  ;;  %vm567_vm1 = vweird.f32 %v853_v3 }
 0x22a   :  { %854 = vrsqrt.f32 %v545_v17  ;;  %v536_v48 = vmul.f32 0.03125, %v513_v20  ;;  %vm568_vm3 = vmor %vm566_vm2, %vm567_vm1  ;;  %vm576_vm5 = vweird.f32 %v545_v17 }
 0x22b   :  { %v562_v51 = vmul.f32 %v853_v3, %v561_v46 }
 0x22c   :  { %v552_v47 = vadd.f32 1e-06, %v536_v48 }
 0x22d   :  { %v563_v25 = vmul.f32 0.5, %v562_v51 }
 0x22e   :  { %856 = vrsqrt.f32 %v552_v47  ;;  %vm646_vm8 = vweird.f32 %v552_v47 }
 0x22f   :  { %v564_v22 = vsub.f32 1.5, %v563_v25 }
 0x230   :  { %v855_v21 = vpop.eup %854 }
 0x231   :  { %v565_v28 = vmul.f32 %v853_v3, %v564_v22  ;;  %v571_v49 = vmul.f32 %v855_v21, %v545_v17  ;;  %v501_v57 = vpop.xlane.xlu0 %500  ;;  %v515_v23 = vpop.xlane.xlu1 %514  ;;  %vm577_vm4 = vweird.f32 %v855_v21 }
 0x232   :  { %v530_v60 = vmul.f32 0.03125, %v501_v57  ;;  %v537_v35 = vmul.f32 0.03125, %v515_v23  ;;  %vm578_vm6 = vmor %vm576_vm5, %vm577_vm4 }
 0x233   :  { %v569_v61 = vsel %vm568_vm3, %v853_v3, %v565_v28  ;;  %v572_v53 = vmul.f32 %v855_v21, %v571_v49 }
 0x234   :  { %v857_v41 = vpop.eup %856  ;;  %v720_v1 = vmul.f32 %v569_v61, %v1188_v5  ;;  %v546_v2 = vadd.f32 1e-06, %v530_v60  ;;  %v1294_v45 = vadd.f32 1e-06, %v537_v35 }
 0x235   :  { %v573_v55 = vmul.f32 0.5, %v572_v53  ;;  %v641_v40 = vmul.f32 %v857_v41, %v552_v47  ;;  %vm647_vm7 = vweird.f32 %v857_v41 }
 0x236   :  { %v740_v6 = vmul.f32 %v1286_v59, %v720_v1  ;;  %858 = vrsqrt.f32 %v546_v2  ;;  %vm648_vm9 = vmor %vm646_vm8, %vm647_vm7  ;;  %vm586_vm12 = vweird.f32 %v546_v2  ;;  %vm656_vm14 = vweird.f32 %v1294_v45 }
 0x237   :  { %v574_v7 = vsub.f32 1.5, %v573_v55  ;;  %v642_v56 = vmul.f32 %v857_v41, %v641_v40  ;;  %860 = vrsqrt.f32 %v1294_v45 }
 0x238   :  { %v760_v8 = vadd.f32 %v1291_v63, %v740_v6 }
 0x239   :  { %v575_v9 = vmul.f32 %v855_v21, %v574_v7  ;;  %v643_v10 = vmul.f32 0.5, %v642_v56  ;;  %v503_v11 = vpop.xlane.xlu1 %502 }
 0x23a   :  { %776 = vst [vmem:[#allocation9] sm:$0xff] %v760_v8  ;;  %v531_v5 = vmul.f32 0.03125, %v503_v11 }
 0x23b   :  { %v579_v58 = vsel %vm578_vm6, %v855_v21, %v575_v9  ;;  %v644_v15 = vsub.f32 1.5, %v643_v10 }
 0x23c   :  { %v859_v24 = vpop.eup %858  ;;  %v721_v26 = vmul.f32 %v579_v58, %v1194_v44  ;;  %v1300_v31 = vadd.f32 1e-06, %v531_v5 }
 0x23d   :  { %v861_v0 = vpop.eup %860  ;;  %v645_v32 = vmul.f32 %v857_v41, %v644_v15  ;;  %v581_v36 = vmul.f32 %v859_v24, %v546_v2  ;;  %v517_v37 = vpop.xlane.xlu2 %516  ;;  %vm587_vm10 = vweird.f32 %v859_v24 }
 0x23e   :  { %v741_v16 = vmul.f32 %v1286_v59, %v721_v26  ;;  %v651_v29 = vmul.f32 %v861_v0, %v1294_v45  ;;  %862 = vrsqrt.f32 %v1300_v31  ;;  %v538_v42 = vmul.f32 0.03125, %v517_v37  ;;  %vm588_vm13 = vmor %vm586_vm12, %vm587_vm10 }
 0x23f   :  { %v649_v38 = vsel %vm648_vm9, %v857_v41, %v645_v32  ;;  %v582_v18 = vmul.f32 %v859_v24, %v581_v36  ;;  %vm657_vm11 = vweird.f32 %v861_v0  ;;  %vm596_vm1 = vweird.f32 %v1300_v31 }
 0x240   :  { %v761_v43 = vadd.f32 %v1291_v63, %v741_v16  ;;  %v728_v44 = vmul.f32 %v649_v38, %v1200_v14  ;;  %v652_v3 = vmul.f32 %v861_v0, %v651_v29  ;;  %v1307_v46 = vadd.f32 1e-06, %v538_v42  ;;  %vm658_vm15 = vmor %vm656_vm14, %vm657_vm11 }
 0x241   :  { %v583_v17 = vmul.f32 0.5, %v582_v18 }
 0x242   :  { %777 = vst [vmem:[#allocation9 + $0x8] sm:$0xff] %v761_v43  ;;  %v748_v20 = vmul.f32 %v1286_v59, %v728_v44  ;;  %v653_v48 = vmul.f32 0.5, %v652_v3  ;;  %864 = vrsqrt.f32 %v1307_v46  ;;  %vm666_vm4 = vweird.f32 %v1307_v46 }
 0x243   :  { %v584_v51 = vsub.f32 1.5, %v583_v17 }
 0x244   :  { %v863_v47 = vpop.eup %862  ;;  %v768_v25 = vadd.f32 %v1291_v63, %v748_v20  ;;  %v654_v22 = vsub.f32 1.5, %v653_v48 }
 0x245   :  { %v585_v21 = vmul.f32 %v859_v24, %v584_v51  ;;  %v591_v14 = vmul.f32 %v863_v47, %v1300_v31  ;;  %v505_v28 = vpop.xlane.xlu2 %504  ;;  %v519_v49 = vpop.xlane.xlu0 %518  ;;  %vm597_vm0 = vweird.f32 %v863_v47 }
 0x246   :  { %784 = vst [vmem:[#allocation9 + $0x40] sm:$0xff] %v768_v25  ;;  %v655_v57 = vmul.f32 %v861_v0, %v654_v22  ;;  %v532_v23 = vmul.f32 0.03125, %v505_v28  ;;  %v539_v60 = vmul.f32 0.03125, %v519_v49  ;;  %vm598_vm2 = vmor %vm596_vm1, %vm597_vm0 }
 0x247   :  { %v589_v35 = vsel %vm588_vm13, %v859_v24, %v585_v21  ;;  %v592_v61 = vmul.f32 %v863_v47, %v591_v14 }
 0x248   :  { %v722_v53 = vmul.f32 %v589_v35, %v1206_v30  ;;  %v659_v41 = vsel %vm658_vm15, %v861_v0, %v655_v57  ;;  %v1315_v1 = vadd.f32 1e-06, %v532_v23  ;;  %v1317_v2 = vadd.f32 1e-06, %v539_v60  ;;  %v865_v55 = vpop.eup %864 }
 0x249   :  { %v729_v40 = vmul.f32 %v659_v41, %v1209_v33  ;;  %v593_v6 = vmul.f32 0.5, %v592_v61  ;;  %v521_v7 = vpop.xlane.xlu1 %520  ;;  %v661_v45 = vmul.f32 %v865_v55, %v1307_v46  ;;  %vm667_vm3 = vweird.f32 %v865_v55 }
 0x24a   :  { %v742_v56 = vmul.f32 %v1286_v59, %v722_v53  ;;  %866 = vrsqrt.f32 %v1315_v1  ;;  %v540_v11 = vmul.f32 0.03125, %v521_v7  ;;  %vm668_vm5 = vmor %vm666_vm4, %vm667_vm3  ;;  %vm606_vm8 = vweird.f32 %v1315_v1 }
 0x24b   :  { %v749_v8 = vmul.f32 %v1286_v59, %v729_v40  ;;  %v594_v9 = vsub.f32 1.5, %v593_v6  ;;  %868 = vrsqrt.f32 %v1317_v2  ;;  %v662_v10 = vmul.f32 %v865_v55, %v661_v45 }
 0x24c   :  { %v762_v30 = vadd.f32 %v1291_v63, %v742_v56  ;;  %v1328_v24 = vadd.f32 1e-06, %v540_v11  ;;  %vm676_vm10 = vweird.f32 %v1317_v2 }
 0x24d   :  { %v769_v33 = vadd.f32 %v1291_v63, %v749_v8  ;;  %v595_v5 = vmul.f32 %v863_v47, %v594_v9  ;;  %v507_v58 = vpop.xlane.xlu0 %506  ;;  %v663_v15 = vmul.f32 0.5, %v662_v10 }
 0x24e   :  { %778 = vst [vmem:[#allocation9 + $0x10] sm:$0xff] %v762_v30  ;;  %v533_v26 = vmul.f32 0.03125, %v507_v58  ;;  %870 = vrsqrt.f32 %v1328_v24  ;;  %vm686_vm13 = vweird.f32 %v1328_v24 }
 0x24f   :  { %785 = vst [vmem:[#allocation9 + $0x48] sm:$0xff] %v769_v33  ;;  %v599_v0 = vsel %vm598_vm2, %v863_v47, %v595_v5  ;;  %v664_v37 = vsub.f32 1.5, %v663_v15 }
 0x250   :  { %v867_v32 = vpop.eup %866  ;;  %v723_v36 = vmul.f32 %v599_v0, %v1218_v39  ;;  %v1333_v31 = vadd.f32 1e-06, %v533_v26 }
 0x251   :  { %v869_v16 = vpop.eup %868  ;;  %v601_v29 = vmul.f32 %v867_v32, %v1315_v1  ;;  %v509_v38 = vpop.xlane.xlu1 %508  ;;  %v665_v42 = vmul.f32 %v865_v55, %v664_v37  ;;  %vm607_vm6 = vweird.f32 %v867_v32 }
 0x252   :  { %v743_v18 = vmul.f32 %v1286_v59, %v723_v36  ;;  %v671_v43 = vmul.f32 %v869_v16, %v1317_v2  ;;  %872 = vrsqrt.f32 %v1333_v31  ;;  %v534_v39 = vmul.f32 0.03125, %v509_v38  ;;  %vm608_vm9 = vmor %vm606_vm8, %vm607_vm6 }
 0x253   :  { %v602_v44 = vmul.f32 %v867_v32, %v601_v29  ;;  %v669_v17 = vsel %vm668_vm5, %v865_v55, %v665_v42  ;;  %vm677_vm7 = vweird.f32 %v869_v16  ;;  %vm616_vm0 = vweird.f32 %v1333_v31 }
 0x254   :  { %v763_v3 = vadd.f32 %v1291_v63, %v743_v18  ;;  %v672_v20 = vmul.f32 %v869_v16, %v671_v43  ;;  %v730_v48 = vmul.f32 %v669_v17, %v1224_v19  ;;  %v1341_v47 = vadd.f32 1e-06, %v534_v39  ;;  %v871_v25 = vpop.eup %870  ;;  %vm678_vm11 = vmor %vm676_vm10, %vm677_vm7 }
 0x255   :  { %v603_v51 = vmul.f32 0.5, %v602_v44  ;;  %v681_v14 = vmul.f32 %v871_v25, %v1328_v24  ;;  %vm687_vm12 = vweird.f32 %v871_v25 }
 0x256   :  { %779 = vst [vmem:[#allocation9 + $0x18] sm:$0xff] %v763_v3  ;;  %v673_v22 = vmul.f32 0.5, %v672_v20  ;;  %v750_v46 = vmul.f32 %v1286_v59, %v730_v48  ;;  %874 = vrsqrt.f32 %v1341_v47  ;;  %vm688_vm14 = vmor %vm686_vm13, %vm687_vm12  ;;  %vm626_vm3 = vweird.f32 %v1341_v47 }
 0x257   :  { %v604_v21 = vsub.f32 1.5, %v603_v51  ;;  %v682_v23 = vmul.f32 %v871_v25, %v681_v14 }
 0x258   :  { %v674_v28 = vsub.f32 1.5, %v673_v22  ;;  %v873_v49 = vpop.eup %872  ;;  %v770_v57 = vadd.f32 %v1291_v63, %v750_v46 }
 0x259   :  { %v605_v19 = vmul.f32 %v867_v32, %v604_v21  ;;  %v525_v60 = vpop.xlane.xlu0 %524  ;;  %v511_v35 = vpop.xlane.xlu2 %510  ;;  %v611_v53 = vmul.f32 %v873_v49, %v1333_v31  ;;  %v683_v40 = vmul.f32 0.5, %v682_v23  ;;  %vm617_vm15 = vweird.f32 %v873_v49 }
 0x25a   :  { %v675_v61 = vmul.f32 %v869_v16, %v674_v28  ;;  %v542_v41 = vmul.f32 0.03125, %v525_v60  ;;  %786 = vst [vmem:[#allocation9 + $0x50] sm:$0xff] %v770_v57  ;;  %v535_v6 = vmul.f32 0.03125, %v511_v35  ;;  %vm618_vm1 = vmor %vm616_vm0, %vm617_vm15 }
 0x25b   :  { %v609_v55 = vsel %vm608_vm9, %v867_v32, %v605_v19  ;;  %v612_v1 = vmul.f32 %v873_v49, %v611_v53  ;;  %v684_v9 = vsub.f32 1.5, %v683_v40 }
 0x25c   :  { %v724_v7 = vmul.f32 %v609_v55, %v1230_v52  ;;  %v679_v56 = vsel %vm678_vm11, %v869_v16, %v675_v61  ;;  %v1352_v45 = vadd.f32 1e-06, %v542_v41  ;;  %v1355_v2 = vadd.f32 1e-06, %v535_v6  ;;  %v875_v30 = vpop.eup %874 }
 0x25d   :  { %v731_v8 = vmul.f32 %v679_v56, %v1233_v54  ;;  %v613_v11 = vmul.f32 0.5, %v612_v1  ;;  %v685_v5 = vmul.f32 %v871_v25, %v684_v9  ;;  %v621_v52 = vmul.f32 %v875_v30, %v1341_v47 }
 0x25e   :  { %v744_v10 = vmul.f32 %v1286_v59, %v724_v7  ;;  %876 = vrsqrt.f32 %v1352_v45  ;;  %vm627_vm2 = vweird.f32 %v875_v30  ;;  %vm706_vm6 = vweird.f32 %v1352_v45 }
 0x25f   :  { %v751_v33 = vmul.f32 %v1286_v59, %v731_v8  ;;  %v614_v54 = vsub.f32 1.5, %v613_v11  ;;  %878 = vrsqrt.f32 %v1355_v2  ;;  %v689_v26 = vsel %vm688_vm14, %v871_v25, %v685_v5  ;;  %vm628_vm4 = vmor %vm626_vm3, %vm627_vm2 }
 0x260   :  { %v764_v58 = vadd.f32 %v1291_v63, %v744_v10  ;;  %v622_v0 = vmul.f32 %v875_v30, %v621_v52  ;;  %v732_v24 = vmul.f32 %v689_v26, %v1242_v50  ;;  %vm636_vm9 = vweird.f32 %v1355_v2 }
 0x261   :  { %v771_v15 = vadd.f32 %v1291_v63, %v751_v33  ;;  %v523_v32 = vpop.xlane.xlu2 %522  ;;  %v527_v36 = vpop.xlane.xlu1 %526  ;;  %v615_v37 = vmul.f32 %v873_v49, %v614_v54 }
 0x262   :  { %780 = vst [vmem:[#allocation9 + $0x20] sm:$0xff] %v764_v58  ;;  %v541_v16 = vmul.f32 0.03125, %v523_v32  ;;  %v543_v29 = vmul.f32 0.03125, %v527_v36  ;;  %v623_v38 = vmul.f32 0.5, %v622_v0  ;;  %v752_v42 = vmul.f32 %v1286_v59, %v732_v24 }
 0x263   :  { %787 = vst [vmem:[#allocation9 + $0x58] sm:$0xff] %v771_v15  ;;  %v619_v43 = vsel %vm618_vm1, %v873_v49, %v615_v37 }
 0x264   :  { %v877_v18 = vpop.eup %876  ;;  %v557_v44 = vadd.f32 1e-06, %v541_v16  ;;  %v1368_v39 = vadd.f32 1e-06, %v543_v29  ;;  %v725_v31 = vmul.f32 %v619_v43, %v1248_v34  ;;  %v624_v3 = vsub.f32 1.5, %v623_v38 }
 0x265   :  { %v701_v17 = vmul.f32 %v877_v18, %v1352_v45  ;;  %v879_v50 = vpop.eup %878  ;;  %v772_v20 = vadd.f32 %v1291_v63, %v752_v42  ;;  %vm707_vm5 = vweird.f32 %v877_v18 }
 0x266   :  { %880 = vrsqrt.f32 %v557_v44  ;;  %v745_v48 = vmul.f32 %v1286_v59, %v725_v31  ;;  %v625_v51 = vmul.f32 %v875_v30, %v624_v3  ;;  %v631_v22 = vmul.f32 %v879_v50, %v1355_v2  ;;  %vm708_vm8 = vmor %vm706_vm6, %vm707_vm5 }
 0x267   :  { %v702_v25 = vmul.f32 %v877_v18, %v701_v17  ;;  %788 = vst [vmem:[#allocation9 + $0x60] sm:$0xff] %v772_v20  ;;  %882 = vrsqrt.f32 %v1368_v39  ;;  %vm637_vm7 = vweird.f32 %v879_v50  ;;  %vm696_vm12 = vweird.f32 %v557_v44 }
 0x268   :  { %v765_v34 = vadd.f32 %v1291_v63, %v745_v48  ;;  %v629_v46 = vsel %vm628_vm4, %v875_v30, %v625_v51  ;;  %v632_v14 = vmul.f32 %v879_v50, %v631_v22  ;;  %vm638_vm10 = vmor %vm636_vm9, %vm637_vm7  ;;  %vm716_vm15 = vweird.f32 %v1368_v39 }
 0x269   :  { %v703_v21 = vmul.f32 0.5, %v702_v25  ;;  %v726_v28 = vmul.f32 %v629_v46, %v1254_v4 }
 0x26a   :  { %781 = vst [vmem:[#allocation9 + $0x28] sm:$0xff] %v765_v34  ;;  %v633_v49 = vmul.f32 0.5, %v632_v14 }
 0x26b   :  { %v704_v47 = vsub.f32 1.5, %v703_v21  ;;  %v746_v19 = vmul.f32 %v1286_v59, %v726_v28 }
 0x26c   :  { %v881_v57 = vpop.eup %880  ;;  %v634_v60 = vsub.f32 1.5, %v633_v49 }
 0x26d   :  { %v705_v23 = vmul.f32 %v877_v18, %v704_v47  ;;  %v691_v35 = vmul.f32 %v881_v57, %v557_v44  ;;  %v883_v61 = vpop.eup %882  ;;  %v766_v53 = vadd.f32 %v1291_v63, %v746_v19  ;;  %vm697_vm11 = vweird.f32 %v881_v57 }
 0x26e   :  { %v635_v41 = vmul.f32 %v879_v50, %v634_v60  ;;  %v711_v40 = vmul.f32 %v883_v61, %v1368_v39  ;;  %vm717_vm13 = vweird.f32 %v883_v61  ;;  %vm698_vm14 = vmor %vm696_vm12, %vm697_vm11 }
 0x26f   :  { %v709_v4 = vsel %vm708_vm8, %v877_v18, %v705_v23  ;;  %v692_v55 = vmul.f32 %v881_v57, %v691_v35  ;;  %782 = vst [vmem:[#allocation9 + $0x30] sm:$0xff] %v766_v53  ;;  %vm718_vm0 = vmor %vm716_vm15, %vm717_vm13 }
 0x270   :  { %v734_v6 = vmul.f32 %v709_v4, %v1260_v12  ;;  %v639_v7 = vsel %vm638_vm10, %v879_v50, %v635_v41  ;;  %v712_v1 = vmul.f32 %v883_v61, %v711_v40 }
 0x271   :  { %v693_v56 = vmul.f32 0.5, %v692_v55  ;;  %v727_v8 = vmul.f32 %v639_v7, %v1263_v13 }
 0x272   :  { %v754_v45 = vmul.f32 %v1286_v59, %v734_v6  ;;  %v713_v30 = vmul.f32 0.5, %v712_v1 }
 0x273   :  { %v694_v9 = vsub.f32 1.5, %v693_v56  ;;  %v747_v10 = vmul.f32 %v1286_v59, %v727_v8 }
 0x274   :  { %v774_v2 = vadd.f32 %v1291_v63, %v754_v45  ;;  %v714_v33 = vsub.f32 1.5, %v713_v30 }
 0x275   :  { %v695_v11 = vmul.f32 %v881_v57, %v694_v9  ;;  %v767_v12 = vadd.f32 %v1291_v63, %v747_v10 }
 0x276   :  { %790 = vst [vmem:[#allocation9 + $0x70] sm:$0xff] %v774_v2  ;;  %v715_v52 = vmul.f32 %v883_v61, %v714_v33 }
 0x277   :  { %v699_v5 = vsel %vm698_vm14, %v881_v57, %v695_v11  ;;  %783 = vst [vmem:[#allocation9 + $0x38] sm:$0xff] %v767_v12 }
 0x278   :  { %v733_v13 = vmul.f32 %v699_v5, %v1272_v27  ;;  %v719_v58 = vsel %vm718_vm0, %v883_v61, %v715_v52 }
 0x279   :  { %v735_v15 = vmul.f32 %v719_v58, %v1275_v62 }
 0x27a   :  { %v753_v54 = vmul.f32 %v1286_v59, %v733_v13 }
 0x27b   :  { %v755_v0 = vmul.f32 %v1286_v59, %v735_v15 }
 0x27c   :  { %v773_v26 = vadd.f32 %v1291_v63, %v753_v54 }
 0x27d   :  { %v775_v32 = vadd.f32 %v1291_v63, %v755_v0 }
 0x27e   :  { %789 = vst [vmem:[#allocation9 + $0x68] sm:$0xff] %v773_v26 }
 0x27f   :  { %791 = vst [vmem:[#allocation9 + $0x78] sm:$0xff] %v775_v32 }
 0x280   :  { %804 = dma.vmem_to_hbm [thread:$0]  %s797_s4, 2048, %s799_s13, [#allocation5], %s987_s26, %s987_s26, %s988_s27  }
 0x281   :  { %984 = dma.done.wait [#allocation5], 2048  }
 0x282   :  { %985 = vsyncadd [#allocation5], 4294965248 }
 0x283   :  { %809 = vsyncpa [#allocation4], 1 }
 0x284   :  { %810 = vsyncpa [#allocation7], 1 }
 0x285   :  { %811 = vsyncpa [#allocation5], 1 }

</bundles_post_ra>
